<compile_context>
chip_gen: v7x
topology: tpu7x:2x2x1
jax: 0.10.0
libtpu: 0.0.40
codegen_flags: <defaults>
</compile_context>

<pallas_src>
import functools
import numpy as np
import jax
import jax.numpy as jnp
from jax.experimental import pallas as pl
from jax.experimental.pallas import tpu as pltpu

BN_EPS = 1e-5


# ----------------------------------------------------------------------------
# Host-side (shape-only) constant builders
# ----------------------------------------------------------------------------
def _interp_matrix(out_size: int, in_size: int) -> np.ndarray:
    """PyTorch bilinear interpolation weights, align_corners=False."""
    i = np.arange(out_size, dtype=np.float64)
    scale = in_size / out_size
    src = np.maximum((i + 0.5) * scale - 0.5, 0.0)          # half-pixel, clamp>=0
    i0 = np.minimum(np.floor(src).astype(np.int64), in_size - 1)
    i1 = np.minimum(i0 + 1, in_size - 1)
    lam = src - i0
    M = np.zeros((out_size, in_size), dtype=np.float32)
    rows = np.arange(out_size)
    np.add.at(M, (rows, i0), (1.0 - lam).astype(np.float32))
    np.add.at(M, (rows, i1), lam.astype(np.float32))
    return M


def _resize_matrix(Hout, Wout, Hin, Win) -> np.ndarray:
    """(Hin*Win, Hout*Wout) bilinear resize operator (columns = output pixels)."""
    wh = _interp_matrix(Hout, Hin)                           # (Hout, Hin)
    ww = _interp_matrix(Wout, Win)                           # (Wout, Win)
    return np.kron(wh, ww).T.astype(np.float32)              # (Hin*Win, HW)


def _tap_masks(Hout, Wout) -> np.ndarray:
    """(9, HW) f32 border masks for the nine 3x3 taps (zero-padding)."""
    HW = Hout * Wout
    h = np.repeat(np.arange(Hout), Wout)
    w = np.tile(np.arange(Wout), Hout)
    masks = np.zeros((9, HW), np.float32)
    t = 0
    for dy in (-1, 0, 1):
        for dx in (-1, 0, 1):
            hv = (h + dy >= 0) & (h + dy < Hout)
            wv = (w + dx >= 0) & (w + dx < Wout)
            masks[t] = (hv & wv).astype(np.float32)
            t += 1
    return masks


# ----------------------------------------------------------------------------
# Kernel 1: per-sample resize + 3x3 conv (+ partial BN stats)
# ----------------------------------------------------------------------------
def _resize_conv_kernel(x_ref, r_ref, w_ref, m_ref, pre_ref, stat_ref,
                        *, Hout, Wout):
    # x_ref:   (Cin, Kin_pad)   one sample, pixels lane-dense (zero-padded)
    # r_ref:   (Kin_pad, HW)    bilinear resize matrix
    # w_ref:   (Cout, 9*Cin)    conv weight, K ordered (tap, ci)
    # m_ref:   (9, HW)          border masks per tap
    # pre_ref: (Cout, HW)       pre-BN activations for this sample
    # stat_ref:(Cout, 2)        per-sample [sum, sumsq] per channel
    HW = Hout * Wout

    # 1) Bilinear resize for this sample: one MXU matmul.
    resized = jnp.dot(x_ref[...], r_ref[...],
                      preferred_element_type=jnp.float32)    # (Cin, HW)
    masks = m_ref[...]                                       # (9, HW)

    # 2) Nine 3x3 tap windows: lane rolls (XLU) + border masks (VPU) -- these
    #    units are idle while the MXU runs, so the shifts are ~free.  Stack on
    #    sublanes to form the im2col columns.
    taps = []
    t = 0
    for dy in (-1, 0, 1):
        for dx in (-1, 0, 1):
            d = dy * Wout + dx
            if d == 0:
                taps.append(resized)                         # center tap, no mask
            else:
                shifted = pltpu.roll(resized, shift=(-d) % HW, axis=1)
                taps.append(shifted * masks[t:t + 1, :])
            t += 1
    cols = jnp.concatenate(taps, axis=0)                     # (9*Cin, HW)

    # 3) 3x3 conv as one matmul.  Conv bias omitted: training-mode BatchNorm
    #    cancels it exactly.
    pre = jnp.dot(w_ref[...], cols,
                  preferred_element_type=jnp.float32)        # (Cout, HW)
    pre_ref[...] = pre

    # 4) Per-sample partial BN statistics (reduced across N in kernel 2).
    s1 = jnp.sum(pre, axis=1, keepdims=True)                 # (Cout, 1)
    s2 = jnp.sum(pre * pre, axis=1, keepdims=True)           # (Cout, 1)
    stat_ref[...] = jnp.concatenate([s1, s2], axis=1)        # (Cout, 2)


# ----------------------------------------------------------------------------
# Kernel 2: BN finalize (training-mode biased stats) + ReLU, per-sample block
# ----------------------------------------------------------------------------
def _bn_relu_kernel(pre_ref, stat_ref, g_ref, b_ref, o_ref, *, inv_count):
    # pre_ref: (Cout, HW); stat_ref: (N, Cout, 2); g/b: (Cout, 1); o: (Cout, HW)
    st = jnp.sum(stat_ref[...], axis=0)                      # (Cout, 2) over batch
    mean = st[:, 0:1] * inv_count                            # (Cout, 1)
    var = st[:, 1:2] * inv_count - mean * mean               # biased batch var
    scale = jax.lax.rsqrt(var + BN_EPS) * g_ref[...]         # (Cout, 1)
    shift = b_ref[...] - mean * scale
    o_ref[...] = jnp.maximum(pre_ref[...] * scale + shift, 0.0)


# ----------------------------------------------------------------------------
# Wrapper
# ----------------------------------------------------------------------------
def upblock_forward(x_nchw, out_size, params):
    """x_nchw: (N, Cin, Hin, Win) float32; out_size: (Hout, Wout)."""
    N, Cin, Hin, Win = x_nchw.shape
    Hout, Wout = out_size
    HW = Hout * Wout
    # Lane-dense layout requirement (see TODO at top for the general case).
    assert HW % 128 == 0, "Hout*Wout must be a multiple of 128"
    w = params['w']                                          # (Cout, Cin, 3, 3)
    Cout = w.shape[0]                                        # Cout % 8 == 0 keeps
                                                             # sublane tiling clean

    Kin = Hin * Win
    Kin_pad = ((Kin + 127) // 128) * 128                     # lane-dense input rows

    # Per-sample rows = channels, lanes = flattened input pixels (zero-padded).
    x3 = x_nchw.reshape(N, Cin, Kin).astype(jnp.float32)
    if Kin_pad != Kin:
        x3 = jnp.pad(x3, ((0, 0), (0, 0), (0, Kin_pad - Kin)))

    r_np = np.zeros((Kin_pad, HW), np.float32)
    r_np[:Kin] = _resize_matrix(Hout, Wout, Hin, Win)
    r = jnp.asarray(r_np)                                    # (Kin_pad, HW)
    masks = jnp.asarray(_tap_masks(Hout, Wout))              # (9, HW)

    # Conv weight: K ordered (tap=ky*3+kx, ci) to match the in-kernel stacking.
    w2 = jnp.transpose(w.astype(jnp.float32), (0, 2, 3, 1)).reshape(Cout, 9 * Cin)

    gamma = params['gamma'].reshape(Cout, 1).astype(jnp.float32)
    beta = params['beta'].reshape(Cout, 1).astype(jnp.float32)
    # params['b'] is intentionally unused: exactly cancelled by training-mode BN.

    cparams = pltpu.CompilerParams(
        dimension_semantics=("parallel",),
        vmem_limit_bytes=64 * 1024 * 1024,
    )

    # Phase 1: resize + conv + per-sample partial BN stats, tiled over batch.
    pre, stats = pl.pallas_call(
        functools.partial(_resize_conv_kernel, Hout=Hout, Wout=Wout),
        grid=(N,),
        in_specs=[
            pl.BlockSpec((None, Cin, Kin_pad), lambda n: (n, 0, 0)),
            pl.BlockSpec((Kin_pad, HW), lambda n: (0, 0)),
            pl.BlockSpec((Cout, 9 * Cin), lambda n: (0, 0)),
            pl.BlockSpec((9, HW), lambda n: (0, 0)),
        ],
        out_specs=(
            pl.BlockSpec((None, Cout, HW), lambda n: (n, 0, 0)),
            pl.BlockSpec((None, Cout, 2), lambda n: (n, 0, 0)),
        ),
        out_shape=(
            jax.ShapeDtypeStruct((N, Cout, HW), jnp.float32),
            jax.ShapeDtypeStruct((N, Cout, 2), jnp.float32),
        ),
        compiler_params=cparams,
    )(x3, r, w2, masks)

    # Phase 2: BN finalize (stats reduced in-kernel, tiny) + ReLU, tiled over batch.
    inv_count = 1.0 / float(N * HW)
    out = pl.pallas_call(
        functools.partial(_bn_relu_kernel, inv_count=inv_count),
        grid=(N,),
        in_specs=[
            pl.BlockSpec((None, Cout, HW), lambda n: (n, 0, 0)),
            pl.BlockSpec((N, Cout, 2), lambda n: (0, 0, 0)),
            pl.BlockSpec((Cout, 1), lambda n: (0, 0)),
            pl.BlockSpec((Cout, 1), lambda n: (0, 0)),
        ],
        out_specs=pl.BlockSpec((None, Cout, HW), lambda n: (n, 0, 0)),
        out_shape=jax.ShapeDtypeStruct((N, Cout, HW), jnp.float32),
        compiler_params=cparams,
    )(pre, stats, gamma, beta)

    # Pure reshape back to NCHW (HW already lane-dense, no transpose).
    return out.reshape(N, Cout, Hout, Wout)


# ----------------------------------------------------------------------------
# Pure-JAX reference (identical semantics, WITH the conv bias) for verification
# ----------------------------------------------------------------------------
def upblock_reference(x_nchw, out_size, params):
    Hout, Wout = out_size
    _, _, Hin, Win = x_nchw.shape
    wh = jnp.asarray(_interp_matrix(Hout, Hin))
    ww = jnp.asarray(_interp_matrix(Wout, Win))
    xr = jnp.einsum('oh,nchw->ncow', wh, x_nchw)
    xr = jnp.einsum('pw,ncow->ncop', ww, xr)
    y = jax.lax.conv_general_dilated(
        xr, params['w'], window_strides=(1, 1), padding='SAME',
        dimension_numbers=('NCHW', 'OIHW', 'NCHW'))
    y = y + params['b'].reshape(1, -1, 1, 1)
    mean = jnp.mean(y, axis=(0, 2, 3), keepdims=True)
    var = jnp.mean((y - mean) ** 2, axis=(0, 2, 3), keepdims=True)
    y = (y - mean) * jax.lax.rsqrt(var + BN_EPS)
    y = y * params['gamma'].reshape(1, -1, 1, 1) + params['beta'].reshape(1, -1, 1, 1)
    return jnp.maximum(y, 0.0)


if __name__ == "__main__":
    # Small shapes consistent with the module: in_ch=4, out_ch=8, upsample 8->16.
    N, Cin, Cout = 2, 4, 8
    Hin = Win = 8
    out_size = (16, 16)

    key = jax.random.PRNGKey(0)
    kx, kw, kb, kg, kbeta = jax.random.split(key, 5)
    x = jax.random.normal(kx, (N, Cin, Hin, Win), jnp.float32)
    params = {
        'w': 0.1 * jax.random.normal(kw, (Cout, Cin, 3, 3), jnp.float32),
        'b': 0.1 * jax.random.normal(kb, (Cout,), jnp.float32),
        'gamma': 1.0 + 0.1 * jax.random.normal(kg, (Cout,), jnp.float32),
        'beta': 0.05 * jax.random.normal(kbeta, (Cout,), jnp.float32),
    }

    out = jax.block_until_ready(upblock_forward(x, out_size, params))
    ref = jax.block_until_ready(upblock_reference(x, out_size, params))

    assert out.shape == (N, Cout, out_size[0], out_size[1]), out.shape
    np.testing.assert_allclose(np.asarray(out), np.asarray(ref),
                               rtol=1e-4, atol=1e-4)
    print("KERNEL_OK")
</pallas_src>

<mosaic_0001>
module attributes {stable_mosaic.version = 11 : i64} {
  func.func @_resize_conv_kernel(%arg0: i32, %arg1: memref<1x4x128xf32, #tpu.memory_space<vmem>>, %arg2: memref<128x256xf32, #tpu.memory_space<vmem>>, %arg3: memref<8x36xf32, #tpu.memory_space<vmem>>, %arg4: memref<9x256xf32, #tpu.memory_space<vmem>>, %arg5: memref<1x8x256xf32, #tpu.memory_space<vmem>>, %arg6: memref<1x8x2xf32, #tpu.memory_space<vmem>>) attributes {dimension_semantics = [#tpu.dimension_semantics<parallel>], iteration_bounds = array<i64: 2>, scalar_prefetch = 0 : i64, scratch_operands = 0 : i64, tpu.core_type = #tpu.core_type<tc>, window_params = [{transform_indices = @transform_0, window_bounds = array<i64: 1, 4, 128>}, {pipeline_mode = #tpu.pipeline_mode<synchronous>, transform_indices = @transform_1, window_bounds = array<i64: 128, 256>}, {pipeline_mode = #tpu.pipeline_mode<synchronous>, transform_indices = @transform_2, window_bounds = array<i64: 8, 36>}, {pipeline_mode = #tpu.pipeline_mode<synchronous>, transform_indices = @transform_3, window_bounds = array<i64: 9, 256>}, {transform_indices = @transform_4, window_bounds = array<i64: 1, 8, 256>}, {transform_indices = @transform_5, window_bounds = array<i64: 1, 8, 2>}]} {
    %c0 = arith.constant 0 : index
    %c0_0 = arith.constant 0 : index
    %c0_1 = arith.constant 0 : index
    %0 = vector.load %arg1[%c0, %c0_0, %c0_1] : memref<1x4x128xf32, #tpu.memory_space<vmem>>, vector<1x4x128xf32>
    %1 = vector.shape_cast %0 : vector<1x4x128xf32> to vector<4x128xf32>
    %c0_2 = arith.constant 0 : index
    %c0_3 = arith.constant 0 : index
    %2 = vector.load %arg2[%c0_2, %c0_3] : memref<128x256xf32, #tpu.memory_space<vmem>>, vector<128x256xf32>
    %cst = arith.constant dense<0.000000e+00> : vector<4x256xf32>
    %3 = tpu.matmul %1, %2, %cst {dimension_numbers = #tpu.dot_dimension_numbers<[1], [0], [0], [1], [0, 0, 1, 1], [], []>} : vector<4x128xf32>, vector<128x256xf32>, vector<4x256xf32> -> vector<4x256xf32>
    %c0_4 = arith.constant 0 : index
    %c0_5 = arith.constant 0 : index
    %4 = vector.load %arg4[%c0_4, %c0_5] : memref<9x256xf32, #tpu.memory_space<vmem>>, vector<9x256xf32>
    %c17_i32 = arith.constant 17 : i32
    %5 = tpu.dynamic_rotate %3 by %c17_i32 dim 1 : vector<4x256xf32>, i32 -> vector<4x256xf32>
    %6 = vector.extract_strided_slice %4 {offsets = [0, 0], sizes = [1, 256], strides = [1, 1]} : vector<9x256xf32> to vector<1x256xf32>
    %7 = vector.broadcast %6 : vector<1x256xf32> to vector<4x256xf32>
    %8 = arith.mulf %5, %7 : vector<4x256xf32>
    %c16_i32 = arith.constant 16 : i32
    %9 = tpu.dynamic_rotate %3 by %c16_i32 dim 1 : vector<4x256xf32>, i32 -> vector<4x256xf32>
    %10 = vector.extract_strided_slice %4 {offsets = [1, 0], sizes = [1, 256], strides = [1, 1]} : vector<9x256xf32> to vector<1x256xf32>
    %11 = vector.broadcast %10 : vector<1x256xf32> to vector<4x256xf32>
    %12 = arith.mulf %9, %11 : vector<4x256xf32>
    %c15_i32 = arith.constant 15 : i32
    %13 = tpu.dynamic_rotate %3 by %c15_i32 dim 1 : vector<4x256xf32>, i32 -> vector<4x256xf32>
    %14 = vector.extract_strided_slice %4 {offsets = [2, 0], sizes = [1, 256], strides = [1, 1]} : vector<9x256xf32> to vector<1x256xf32>
    %15 = vector.broadcast %14 : vector<1x256xf32> to vector<4x256xf32>
    %16 = arith.mulf %13, %15 : vector<4x256xf32>
    %c1_i32 = arith.constant 1 : i32
    %17 = tpu.dynamic_rotate %3 by %c1_i32 dim 1 : vector<4x256xf32>, i32 -> vector<4x256xf32>
    %18 = vector.extract_strided_slice %4 {offsets = [3, 0], sizes = [1, 256], strides = [1, 1]} : vector<9x256xf32> to vector<1x256xf32>
    %19 = vector.broadcast %18 : vector<1x256xf32> to vector<4x256xf32>
    %20 = arith.mulf %17, %19 : vector<4x256xf32>
    %c255_i32 = arith.constant 255 : i32
    %21 = tpu.dynamic_rotate %3 by %c255_i32 dim 1 : vector<4x256xf32>, i32 -> vector<4x256xf32>
    %22 = vector.extract_strided_slice %4 {offsets = [5, 0], sizes = [1, 256], strides = [1, 1]} : vector<9x256xf32> to vector<1x256xf32>
    %23 = vector.broadcast %22 : vector<1x256xf32> to vector<4x256xf32>
    %24 = arith.mulf %21, %23 : vector<4x256xf32>
    %c241_i32 = arith.constant 241 : i32
    %25 = tpu.dynamic_rotate %3 by %c241_i32 dim 1 : vector<4x256xf32>, i32 -> vector<4x256xf32>
    %26 = vector.extract_strided_slice %4 {offsets = [6, 0], sizes = [1, 256], strides = [1, 1]} : vector<9x256xf32> to vector<1x256xf32>
    %27 = vector.broadcast %26 : vector<1x256xf32> to vector<4x256xf32>
    %28 = arith.mulf %25, %27 : vector<4x256xf32>
    %c240_i32 = arith.constant 240 : i32
    %29 = tpu.dynamic_rotate %3 by %c240_i32 dim 1 : vector<4x256xf32>, i32 -> vector<4x256xf32>
    %30 = vector.extract_strided_slice %4 {offsets = [7, 0], sizes = [1, 256], strides = [1, 1]} : vector<9x256xf32> to vector<1x256xf32>
    %31 = vector.broadcast %30 : vector<1x256xf32> to vector<4x256xf32>
    %32 = arith.mulf %29, %31 : vector<4x256xf32>
    %c239_i32 = arith.constant 239 : i32
    %33 = tpu.dynamic_rotate %3 by %c239_i32 dim 1 : vector<4x256xf32>, i32 -> vector<4x256xf32>
    %34 = vector.extract_strided_slice %4 {offsets = [8, 0], sizes = [1, 256], strides = [1, 1]} : vector<9x256xf32> to vector<1x256xf32>
    %35 = vector.broadcast %34 : vector<1x256xf32> to vector<4x256xf32>
    %36 = arith.mulf %33, %35 : vector<4x256xf32>
    %37 = tpu.concatenate %8, %12, %16, %20, %3, %24, %28, %32, %36 in 0 : vector<4x256xf32>, vector<4x256xf32>, vector<4x256xf32>, vector<4x256xf32>, vector<4x256xf32>, vector<4x256xf32>, vector<4x256xf32>, vector<4x256xf32>, vector<4x256xf32> -> vector<36x256xf32>
    %c0_6 = arith.constant 0 : index
    %c0_7 = arith.constant 0 : index
    %38 = vector.load %arg3[%c0_6, %c0_7] : memref<8x36xf32, #tpu.memory_space<vmem>>, vector<8x36xf32>
    %cst_8 = arith.constant dense<0.000000e+00> : vector<8x256xf32>
    %39 = tpu.matmul %38, %37, %cst_8 {dimension_numbers = #tpu.dot_dimension_numbers<[1], [0], [0], [1], [0, 0, 1, 1], [], []>} : vector<8x36xf32>, vector<36x256xf32>, vector<8x256xf32> -> vector<8x256xf32>
    %c0_9 = arith.constant 0 : index
    %c0_10 = arith.constant 0 : index
    %c0_11 = arith.constant 0 : index
    %40 = vector.load %arg5[%c0_9, %c0_10, %c0_11] : memref<1x8x256xf32, #tpu.memory_space<vmem>>, vector<1x8x256xf32>
    %41 = vector.shape_cast %40 : vector<1x8x256xf32> to vector<8x256xf32>
    %42 = vector.shape_cast %39 : vector<8x256xf32> to vector<1x8x256xf32>
    tpu.vector_store %arg5[%c0_9, %c0_10, %c0_11], %42 {strides = array<i32>} : memref<1x8x256xf32, #tpu.memory_space<vmem>>, vector<1x8x256xf32>,
    %cst_12 = arith.constant dense<0.000000e+00> : vector<8xf32>
    %43 = vector.multi_reduction <add>, %39, %cst_12 [1] : vector<8x256xf32> to vector<8xf32>
    %44 = vector.shape_cast %43 : vector<8xf32> to vector<8x1xf32>
    %45 = arith.mulf %39, %39 : vector<8x256xf32>
    %cst_13 = arith.constant dense<0.000000e+00> : vector<8xf32>
    %46 = vector.multi_reduction <add>, %45, %cst_13 [1] : vector<8x256xf32> to vector<8xf32>
    %47 = vector.shape_cast %46 : vector<8xf32> to vector<8x1xf32>
    %48 = tpu.concatenate %44, %47 in 1 : vector<8x1xf32>, vector<8x1xf32> -> vector<8x2xf32>
    %c0_14 = arith.constant 0 : index
    %c0_15 = arith.constant 0 : index
    %c0_16 = arith.constant 0 : index
    %49 = vector.load %arg6[%c0_14, %c0_15, %c0_16] : memref<1x8x2xf32, #tpu.memory_space<vmem>>, vector<1x8x2xf32>
    %50 = vector.shape_cast %49 : vector<1x8x2xf32> to vector<8x2xf32>
    %51 = vector.shape_cast %48 : vector<8x2xf32> to vector<1x8x2xf32>
    tpu.vector_store %arg6[%c0_14, %c0_15, %c0_16], %51 {strides = array<i32>} : memref<1x8x2xf32, #tpu.memory_space<vmem>>, vector<1x8x2xf32>,
    return
  }
  func.func @transform_0(%arg0: i32) -> (i32, i32, i32) {
    %c0_i32 = arith.constant 0 : i32
    %c0_i32_0 = arith.constant 0 : i32
    %c0_i32_1 = arith.constant 0 : i32
    return %arg0, %c0_i32, %c0_i32_0 : i32, i32, i32
  }
  func.func @transform_1(%arg0: i32) -> (i32, i32) {
    %c0_i32 = arith.constant 0 : i32
    %c0_i32_0 = arith.constant 0 : i32
    %c0_i32_1 = arith.constant 0 : i32
    return %c0_i32, %c0_i32_0 : i32, i32
  }
  func.func @transform_2(%arg0: i32) -> (i32, i32) {
    %c0_i32 = arith.constant 0 : i32
    %c0_i32_0 = arith.constant 0 : i32
    %c0_i32_1 = arith.constant 0 : i32
    return %c0_i32, %c0_i32_0 : i32, i32
  }
  func.func @transform_3(%arg0: i32) -> (i32, i32) {
    %c0_i32 = arith.constant 0 : i32
    %c0_i32_0 = arith.constant 0 : i32
    %c0_i32_1 = arith.constant 0 : i32
    return %c0_i32, %c0_i32_0 : i32, i32
  }
  func.func @transform_4(%arg0: i32) -> (i32, i32, i32) {
    %c0_i32 = arith.constant 0 : i32
    %c0_i32_0 = arith.constant 0 : i32
    %c0_i32_1 = arith.constant 0 : i32
    return %arg0, %c0_i32, %c0_i32_0 : i32, i32, i32
  }
  func.func @transform_5(%arg0: i32) -> (i32, i32, i32) {
    %c0_i32 = arith.constant 0 : i32
    %c0_i32_0 = arith.constant 0 : i32
    %c0_i32_1 = arith.constant 0 : i32
    return %arg0, %c0_i32, %c0_i32_0 : i32, i32, i32
  }
}

</mosaic_0001>

<bundles_post_ra>
// kernel: tpu_custom_call.1
= control target key start
LH: loop header
LB: loop body
LE: loop exit
PB: predicated region body
PF: predicated region fallthrough
CT: control target
= control target key end

     0   :  { %11 = vsyncpa [#allocation3], 0  ;;  %s1620_s0 = inlined_call_operand.hbm [shape: f32[2,4,128], index: 0, kind: input, shape index: {}]   ;;  %s1621_s1 = inlined_call_operand.hbm [shape: f32[128,256], index: 1, kind: input, shape index: {}]   ;;  %s1622_s2 = inlined_call_operand.hbm [shape: f32[8,36], index: 2, kind: input, shape index: {}]   ;;  %s1623_s3 = inlined_call_operand.hbm [shape: f32[9,256], index: 3, kind: input, shape index: {}]   ;;  %s1624_s4 = inlined_call_operand.hbm [shape: f32[2,8,256], index: 4, kind: output, shape index: {0}]   ;;  %s1625_s5 = inlined_call_operand.hbm [shape: f32[2,8,2], index: 5, kind: output, shape index: {1}]  }
   0x1   :  { %13 = vsyncpa [#allocation3 + $0x1], 0 }
   0x2   :  { %14 = vsyncpa [#allocation6], 0 }
   0x3   :  { %15 = vsyncpa [#allocation9], 0 }
   0x4   :  { %16 = vsyncpa [#allocation4], 0 }
   0x5   :  { %18 = vsyncpa [#allocation4 + $0x1], 0 }
   0x6   :  { %19 = vsyncpa [#allocation12], 0 }
   0x7   :  { %21 = vsyncpa [#allocation12 + $0x1], 0  ;;  %s1262_s18 = smov 0   ;;  %s1264_s19 = smov 0  }
   0x8   :  { %s1266_s20 = smov 0   ;;  %s1268_s21 = smov 0  }
   0x9 LB: > { %s1283_s22 = sadd.s32 4294967295, %s1213_s21   ;;  %s832_s23 = sadd.s32 4294967294, %s1213_s21   ;;  %s1213_s21 = sphi %s1268_s21, %s1648_s21   ;;  %s1209_s20 = sphi %s1266_s20, %s1647_s20   ;;  %s1205_s19 = sphi %s1264_s19, %s1646_s19   ;;  %s1201_s18 = sphi %s1262_s18, %s1645_s18  }
   0xa   : > { %p47_p0 = scmp.ne.s32.totalorder %s1205_s19, %s1201_s18  ;;  %p1626_p1 = scmp.eq.s32.totalorder %s1283_s22, 0 }
   0xb   : > { %p140_p3 = scmp.eq.s32.totalorder %s832_s23, 1  ;;  %p833_p5 = scmp.ge.s32.totalorder %s1213_s21, 1 }
   0xc   : > { %p1292_p4 = por %p1626_p1, %p47_p0  ;;  %p173_p7 = scmp.lt.s32.totalorder %s1213_s21, 3 }
   0xd   : > { %p1297_p6 = por %p140_p3, %p47_p0  ;;  %s1215_s27 = smov [#allocation5]  }
   0xe   : > { %s1629_s24 = scalar_select %p1292_p4, 1, 0 }
   0xf   : > { %s1630_s25 = scalar_select %p1297_p6, 1, 0 }
  0x10   : > { %p1302_p8 = pnand %p833_p5, %p173_p7  ;;  %s185_s28 = sshll.u32 %s1215_s27, 4  ;;  %s1306_s28 = int_to_ptr.vmem [resolvable:$true] %s185_s28 }
  0x11   : > { %s1216_s30 = smov [#allocation7]   ;;  %s1217_s7 = smov [#allocation8]  }
  0x12   : > { %s1631_s26 = scalar_select %p1302_p8, 1, 0 }
  0x13   : > { %p918_p9 = pneg %p1302_p8  ;;  %s199_s6 = sshll.u32 %s1216_s30, 4  ;;  %s1317_s6 = int_to_ptr.vmem [resolvable:$true] %s199_s6 }
  0x14   : > { %s1319_s8 = sshll.u32 %s1217_s7, 4  ;;  %s993_s11 = scalar_lea.hbm %s1621_s1, 4096  ;;  %s210_s8 = int_to_ptr.vmem [resolvable:$true] %s1319_s8 }
  0x15   : > { %p1313_p11 = pnand %p918_p9, %p1626_p1  ;;  %p994_p12 = scmp.ne.s32.totalorder %s1621_s1, %s993_s11 }
  0x16   : > { %p1000_p5 = scmp.lt.u32.totalorder %s993_s11, %s1621_s1 }
  0x17   : > { %p1329_p13 = pneg %p1313_p11 }
  0x19   : > { %p996_p0 = pnand %p1329_p13, %p994_p12 }
  0x1b   : > { %p997_p3 = pneg %p996_p0 }
  0x1d   : > { %p1002_p7 = pnand %p1000_p5, %p997_p3 }
  0x1f   : > { %1005 = shalt.err (!%p1002_p7)
}
  0x20   : > { %s1006_s17 = scalar_lea.vmem %s1306_s28, 4096  ;;  %p1014_p2 = scmp.lt.s32.totalorder %s1306_s28, %s1306_s28 }
  0x21   : > { %p1007_p9 = scmp.ne.s32.totalorder %s1306_s28, %s1006_s17  ;;  %p1015_p6 = scmp.lt.s32.totalorder %s1006_s17, %s1006_s17 }
  0x23   : > { %p1009_p10 = pnand %p1007_p9, %p1329_p13  ;;  %p1016_p12 = por %p1015_p6, %p1014_p2 }
  0x25   : > { %p1010_p1 = pneg %p1009_p10 }
  0x27   : > { %p1017_p0 = pnand %p1016_p12, %p1010_p1 }
  0x29   : > { %1020 = shalt.err (!%p1017_p0)
}
  0x2a   : > { %s1218_s23 = smov 256   ;;  %s1219_s27 = smov 16  }
  0x2b   : > { %921 = dma.hbm_to_vmem [thread:$0]  (!%p1313_p11), %s1621_s1, 4096, %s1306_s28, [#allocation6], %s1218_s23, %s1218_s23, %s1219_s27  }
  0x2c   : > { %s1021_s11 = scalar_lea.hbm %s1622_s2, 128 }
  0x2d   : > { %p1022_p1 = scmp.ne.s32.totalorder %s1622_s2, %s1021_s11  ;;  %p1028_p10 = scmp.lt.u32.totalorder %s1021_s11, %s1622_s2 }
  0x2f   : > { %p1024_p2 = pnand %p1022_p1, %p1329_p13 }
  0x31   : > { %p1025_p6 = pneg %p1024_p2 }
  0x33   : > { %p1030_p3 = pnand %p1028_p10, %p1025_p6 }
  0x35   : > { %1033 = shalt.err (!%p1030_p3)
}
  0x36   : > { %s1034_s28 = scalar_lea.vmem %s1317_s6, 128  ;;  %p1042_p12 = scmp.lt.s32.totalorder %s1317_s6, %s1317_s6 }
  0x37   : > { %p1035_p5 = scmp.ne.s32.totalorder %s1317_s6, %s1034_s28  ;;  %p1043_p0 = scmp.lt.s32.totalorder %s1034_s28, %s1034_s28 }
  0x39   : > { %p1037_p7 = pnand %p1035_p5, %p1329_p13  ;;  %p1044_p1 = por %p1043_p0, %p1042_p12 }
  0x3b   : > { %p1038_p9 = pneg %p1037_p7 }
  0x3d   : > { %p1045_p2 = pnand %p1044_p1, %p1038_p9 }
  0x3f   : > { %1048 = shalt.err (!%p1045_p2)
}
  0x40   : > { %924 = dma.hbm_to_vmem [thread:$0]  (!%p1313_p11), %s1622_s2, 128, %s1317_s6, [#allocation6]  }
  0x41   : > { %s1049_s10 = scalar_lea.hbm %s1623_s3, 512 }
  0x42   : > { %p1050_p6 = scmp.ne.s32.totalorder %s1623_s3, %s1049_s10  ;;  %p1056_p5 = scmp.lt.u32.totalorder %s1049_s10, %s1623_s3 }
  0x44   : > { %p1052_p10 = pnand %p1050_p6, %p1329_p13 }
  0x46   : > { %p1053_p3 = pneg %p1052_p10 }
  0x48   : > { %p1058_p7 = pnand %p1056_p5, %p1053_p3 }
  0x4a   : > { %1061 = shalt.err (!%p1058_p7)
}
  0x4b   : > { %s1062_s16 = scalar_lea.vmem %s210_s8, 512  ;;  %p1070_p1 = scmp.lt.s32.totalorder %s210_s8, %s210_s8 }
  0x4c   : > { %p1063_p9 = scmp.ne.s32.totalorder %s210_s8, %s1062_s16  ;;  %p1071_p2 = scmp.lt.s32.totalorder %s1062_s16, %s1062_s16 }
  0x4e   : > { %p1065_p12 = pnand %p1063_p9, %p1329_p13  ;;  %p1072_p4 = por %p1071_p2, %p1070_p1 }
  0x50   : > { %p1066_p0 = pneg %p1065_p12 }
  0x52   : > { %p1073_p8 = pnand %p1072_p4, %p1066_p0 }
  0x54   : > { %1076 = shalt.err (!%p1073_p8)
}
  0x55   : > { %927 = dma.hbm_to_vmem [thread:$0]  (!%p1313_p11), %s1623_s3, 512, %s210_s8, [#allocation9], %s1218_s23, %s1218_s23, %s1219_s27  }
  0x56   : > { %s1399_s14 = sadd.s32 1, %s1213_s21   ;;  %s34_s17 = sadd.s32 1, %s1209_s20 }
  0x57   : > { %s31_s29 = ssub.s32 %s1213_s21, %s1399_s14  ;;  %p41_p8 = scmp.ne.s32.totalorder %s1209_s20, %s1205_s19 }
  0x58   : > { %p32_p4 = scmp.eq.s32.totalorder %s31_s29, 0  ;;  %p42_p13 = scmp.eq.s32.totalorder %s1213_s21, 0 }
  0x59   : > { %p942_p6 = scmp.lt.s32.totalorder %s1213_s21, 2  ;;  %p1634_p3 = scmp.eq.s32.totalorder %s1283_s22, 1 }
  0x5a   : > { %s1409_s30 = scalar_select %p32_p4, %s1209_s20, %s34_s17  }
  0x5b   : > { %p43_p10 = por %p42_p13, %p41_p8  ;;  %p1413_p5 = por %p1634_p3, %p41_p8 }
  0x5c   : > { %s223_s9 = sand.u32 1, %s1209_s20   ;;  %s839_s10 = sshll.u32 %s1213_s21, 6 }
  0x5d   : > { %s838_s8 = sshll.u32 %s223_s9, 2  ;;  %s1422_s11 = scalar_lea.hbm %s1620_s0, %s839_s10 }
  0x5e   : > { %s227_s12 = scalar_lea.vmem [#allocation2], %s838_s8  ;;  %p1424_p11 = pnand %p942_p6, %p43_p10 }
  0x5f   : > { %s234_s13 = sshll.u32 %s227_s12, 4  ;;  %s224_s16 = scalar_lea.sflag [#allocation3], %s223_s9  ;;  %s1428_s13 = int_to_ptr.vmem [resolvable:$true] %s234_s13 }
  0x60   : > { %s1077_s6 = scalar_lea.hbm %s1422_s11, 64  ;;  %p1079_p9 = pneg %p1424_p11 }
  0x61   : > { %p1078_p7 = scmp.ne.s32.totalorder %s1422_s11, %s1077_s6  ;;  %s1082_s17 = scalar_lea.hbm %s1620_s0, 128 }
  0x62   : > { %p1083_p1 = scmp.lt.u32.totalorder %s1422_s11, %s1620_s0  ;;  %p1084_p2 = scmp.lt.u32.totalorder %s1082_s17, %s1077_s6 }
  0x63   : > { %p1080_p12 = pnand %p1079_p9, %p1078_p7  ;;  %p1086_p8 = scmp.lt.u32.totalorder %s1077_s6, %s1422_s11 }
  0x64   : > { %p1085_p4 = por %p1084_p2, %p1083_p1 }
  0x65   : > { %p1081_p0 = pneg %p1080_p12 }
  0x66   : > { %p1087_p13 = por %p1086_p8, %p1085_p4 }
  0x68   : > { %p1088_p6 = pnand %p1087_p13, %p1081_p0 }
  0x6a   : > { %1091 = shalt.err (!%p1088_p6)
}
  0x6b   : > { %s1092_s9 = scalar_lea.vmem %s1428_s13, 64  ;;  %s1220_s23 = smov [#allocation2]  }
  0x6c   : > { %p1093_p10 = scmp.ne.s32.totalorder %s1428_s13, %s1092_s9  ;;  %s1097_s27 = sshll.u32 %s1220_s23, 4  ;;  %s1098_s27 = int_to_ptr.vmem [resolvable:$false] %s1097_s27 }
  0x6d   : > { %s1099_s12 = scalar_lea.vmem %s1098_s27, 128  ;;  %p1100_p12 = scmp.lt.s32.totalorder %s1428_s13, %s1098_s27 }
  0x6e   : > { %p1095_p3 = pnand %p1093_p10, %p1079_p9  ;;  %p1101_p1 = scmp.lt.s32.totalorder %s1099_s12, %s1092_s9 }
  0x70   : > { %p1096_p7 = pneg %p1095_p3  ;;  %p1102_p2 = por %p1101_p1, %p1100_p12 }
  0x72   : > { %p1103_p4 = pnand %p1102_p2, %p1096_p7 }
  0x74   : > { %1106 = shalt.err (!%p1103_p4)
}
  0x75   : > { %931 = dma.hbm_to_vmem [thread:$0]  (!%p1424_p11), %s1422_s11, 64, %s1428_s13, %s224_s16  }
  0x76   : > { %p1637_p0 = scmp.ne.s32.totalorder %s1631_s26, 0 }
  0x77   : > { %s1458_s6 = sand.u32 (!%p1637_p0), 1, %s1205_s19   ;;  %p1638_p9 = scmp.ne.s32.totalorder (!%p1637_p0), %s1629_s24, 0 }
  0x78   : > { %243 = sbr.rel (%p1637_p0) target bundleno = 907 (0x38b), region = 36  ;;  %s841_s28 = sshll.u32 (!%p1637_p0), %s1458_s6, 2 }
  0x79   : > { %s246_s29 = scalar_lea.sflag (!%p1637_p0), [#allocation3], %s1458_s6  ;;  %s1462_s17 = scalar_lea.vmem (!%p1637_p0), [#allocation2], %s841_s28 }
  0x7f   : > { %1180 = dma.done.wait (%p1638_p9), %s246_s29, 64  }
  0x80   : > { %1182 = vsyncadd (%p1638_p9), %s246_s29, 4294967232  ;;  %p1639_p11 = scmp.eq.s32.totalorder %s1283_s22, 0 }
  0x82   : > { %1184 = dma.done.wait (%p1639_p11), [#allocation6], 4224   ;;  %p1640_p8 = pmov %p1639_p11 }
  0x84   : > { %1186 = vsyncadd (%p1640_p8), [#allocation6], 4294963072  ;;  %p1641_p13 = pmov %p1640_p8 }
  0x85   : > { %p1642_p6 = pmov %p1640_p8 }
  0x86   : > { %1188 = dma.done.wait (%p1641_p13), [#allocation9], 512  }
  0x87   : > { %1190 = vsyncadd (%p1642_p6), [#allocation9], 4294966784  ;;  %v1221_v0 = vmov 0.0   ;;  %v295_v1 = vld [vmem:[#allocation5 + $0x8] sm:$0xff]  ;;  %v297_v2 = vld [vmem:[#allocation5 + $0x18] sm:$0xff]  ;;  %s1222_s24 = smov 1   ;;  %v405_v52 = vlaneseq }
  0x88   : > { %390 = vmatprep.mubr.f32.mxu0 %v1221_v0  ;;  %647 = vmatprep.mubr.f32.mxu1 %v1221_v0  ;;  %v294_v3 = vld [vmem:[#allocation5] sm:$0xff]  ;;  %v860_v4 = vpack.c.bf16 %v297_v2, %v295_v1  ;;  %v296_v5 = vld [vmem:[#allocation5 + $0x10] sm:$0xff]  ;;  %v299_v6 = vld [vmem:[#allocation5 + $0x28] sm:$0xff]  ;;  %s1223_s26 = smov 16   ;;  %s1224_s11 = smov 17   ;;  %vm563_vm4 = vcmask 1043456  }
  0x89   : > { %v301_v7 = vld [vmem:[#allocation5 + $0x38] sm:$0xff]  ;;  %v862_v8 = vpack.c.bf16 %v296_v5, %v294_v3  ;;  %v298_v10 = vld [vmem:[#allocation5 + $0x20] sm:$0xff]  ;;  %v300_v11 = vld [vmem:[#allocation5 + $0x30] sm:$0xff]  ;;  %s1225_s13 = smov 15   ;;  %s1226_s15 = smov 127   ;;  %v411_v55 = vshrl.u32 %v405_v52, 7 }
  0x8a   : > { %v864_v9 = vpack.c.bf16 %v301_v7, %v299_v6  ;;  %v303_v12 = vld [vmem:[#allocation5 + $0x48] sm:$0xff]  ;;  %861 = vmatprep.subr.bf16.mxu0 %v860_v4  ;;  %v305_v13 = vld [vmem:[#allocation5 + $0x58] sm:$0xff]  ;;  %v866_v14 = vpack.c.bf16 %v300_v11, %v298_v10  ;;  %v302_v16 = vld [vmem:[#allocation5 + $0x40] sm:$0xff]  ;;  %s1227_s16 = smov 112   ;;  %s1228_s10 = smov 113   ;;  %v1497_v57 = vand.u32 127, %v405_v52 }
  0x8b   : > { %863 = vmatpush1.bf16.msra.mxu0 %v862_v8  ;;  %v868_v15 = vpack.c.bf16 %v305_v13, %v303_v12  ;;  %v304_v17 = vld [vmem:[#allocation5 + $0x50] sm:$0xff]  ;;  %v307_v18 = vld [vmem:[#allocation5 + $0x68] sm:$0xff]  ;;  %v309_v19 = vld [vmem:[#allocation5 + $0x78] sm:$0xff]  ;;  %s1229_s8 = smov 111   ;;  %v463_v59 = vsub.s32 3, %v411_v55  ;;  %v412_v62 = vsub.s32 0, %v411_v55 }
  0x8c   : > { %865 = vmatprep.subr.bf16.mxu0 %v864_v9  ;;  %v870_v20 = vpack.c.bf16 %v304_v17, %v302_v16  ;;  %v872_v21 = vpack.c.bf16 %v309_v19, %v307_v18  ;;  %v306_v22 = vld [vmem:[#allocation5 + $0x60] sm:$0xff]  ;;  %v308_v23 = vld [vmem:[#allocation5 + $0x70] sm:$0xff]  ;;  %v311_v24 = vld [vmem:[#allocation5 + $0x88] sm:$0xff]  ;;  %v446_v63 = vsub.s32 2, %v411_v55  ;;  %vm458_vm0 = vcmp.lt.s32.totalorder %v1497_v57, 1  ;;  %s845_s9 = sshll.u32 %s1458_s6, 4 }
  0x8d   : > { %v313_v25 = vld [vmem:[#allocation5 + $0x98] sm:$0xff]  ;;  %v874_v26 = vpack.c.bf16 %v308_v23, %v306_v22  ;;  %v310_v28 = vld [vmem:[#allocation5 + $0x80] sm:$0xff]  ;;  %v312_v29 = vld [vmem:[#allocation5 + $0x90] sm:$0xff]  ;;  %v480_v2 = vsub.s32 5, %v411_v55  ;;  %vm407_vm1 = vcmp.lt.s32.totalorder %v1497_v57, 17  ;;  %v429_v5 = vsub.s32 1, %v411_v55 }
  0x8e   : > { %v876_v27 = vpack.c.bf16 %v313_v25, %v311_v24  ;;  %v315_v30 = vld [vmem:[#allocation5 + $0xa8] sm:$0xff]  ;;  %v317_v31 = vld [vmem:[#allocation5 + $0xb8] sm:$0xff]  ;;  %v878_v32 = vpack.c.bf16 %v312_v29, %v310_v28  ;;  %v314_v34 = vld [vmem:[#allocation5 + $0xa0] sm:$0xff]  ;;  %vm441_vm2 = vcmp.lt.s32.totalorder %v1497_v57, 15  ;;  %v514_v8 = vsub.s32 7, %v411_v55  ;;  %s285_s23 = scalar_lea.vmem [#allocation10], %s845_s9 }
  0x8f   : > { %867 = vmatpush1.bf16.msra.mxu0 %v866_v14  ;;  %v880_v33 = vpack.c.bf16 %v317_v31, %v315_v30  ;;  %v316_v35 = vld [vmem:[#allocation5 + $0xb0] sm:$0xff]  ;;  %v319_v36 = vld [vmem:[#allocation5 + $0xc8] sm:$0xff]  ;;  %v321_v37 = vld [vmem:[#allocation5 + $0xd8] sm:$0xff]  ;;  %vm475_vm3 = vcmp.lt.s32.totalorder %v1497_v57, 127  ;;  %vm424_vm5 = vcmp.lt.s32.totalorder %v1497_v57, 16  ;;  %vm509_vm6 = vcmp.lt.s32.totalorder %v1497_v57, 112 }
  0x90   : > { %869 = vmatprep.subr.bf16.mxu0 %v868_v15  ;;  %v882_v38 = vpack.c.bf16 %v316_v35, %v314_v34  ;;  %v884_v39 = vpack.c.bf16 %v321_v37, %v319_v36  ;;  %v318_v40 = vld [vmem:[#allocation5 + $0xc0] sm:$0xff]  ;;  %v320_v41 = vld [vmem:[#allocation5 + $0xd0] sm:$0xff]  ;;  %v323_v42 = vld [vmem:[#allocation5 + $0xe8] sm:$0xff]  ;;  %v497_v22 = vsub.s32 6, %v411_v55  ;;  %vm492_vm7 = vcmp.lt.s32.totalorder %v1497_v57, 113  ;;  %s688_s27 = sshll.u32 %s285_s23, 4  ;;  %s1548_s27 = int_to_ptr.vmem [resolvable:$true] %s688_s27 }
  0x91   : > { %v325_v43 = vld [vmem:[#allocation5 + $0xf8] sm:$0xff]  ;;  %v886_v44 = vpack.c.bf16 %v320_v41, %v318_v40  ;;  %v322_v46 = vld [vmem:[#allocation5 + $0xe0] sm:$0xff]  ;;  %v324_v47 = vld [vmem:[#allocation5 + $0xf0] sm:$0xff]  ;;  %vm526_vm8 = vcmp.lt.s32.totalorder %v1497_v57, 111  ;;  %vm573_vm9 = vcmask 293888   ;;  %s859_s12 = sshll.u32 %s1283_s22, 8 }
  0x92   : > { %v888_v45 = vpack.c.bf16 %v325_v43, %v323_v42  ;;  %v890_v48 = vpack.c.bf16 %v324_v47, %v322_v46  ;;  %v293_v49 = vld [vmem:[%s1462_s17] sm:$0xf]  ;;  %v397_v60 = vld [vmem:[#allocation8] sm:$0xff]  ;;  %v398_v61 = vld [vmem:[#allocation8 + $0x8] sm:$0xff]  ;;  %s686_s17 = scalar_lea.hbm %s1624_s4, %s859_s12 }
  0x93   : > { %871 = vmatpush1.bf16.msra.mxu0 %v870_v20  ;;  %v464_v3 = vrot.slane %v397_v60, %v463_v59  ;;  %v468_v4 = vrot.slane %v398_v61, %v463_v59  ;;  %v413_v6 = vrot.slane %v397_v60, %v412_v62  ;;  %v417_v7 = vrot.slane %v398_v61, %v412_v62 }
  0x94   : > { %873 = vmatprep.subr.bf16.mxu0 %v872_v21  ;;  %v447_v9 = vrot.slane %v397_v60, %v446_v63  ;;  %v451_v10 = vrot.slane %v398_v61, %v446_v63  ;;  %v481_v15 = vrot.slane %v397_v60, %v480_v2  ;;  %v485_v16 = vrot.slane %v398_v61, %v480_v2 }
  0x95   : > { %v430_v19 = vrot.slane %v397_v60, %v429_v5  ;;  %v434_v20 = vrot.slane %v398_v61, %v429_v5  ;;  %v515_v21 = vrot.slane %v397_v60, %v514_v8  ;;  %v519_v25 = vrot.slane %v398_v61, %v514_v8 }
  0x97   : > { %875 = vmatpush1.bf16.msra.mxu0 %v874_v26 }
  0x98   : > { %877 = vmatprep.subr.bf16.mxu0 %v876_v27 }
  0x9b   : > { %879 = vmatpush1.bf16.msra.mxu0 %v878_v32 }
  0x9c   : > { %881 = vmatprep.subr.bf16.mxu0 %v880_v33 }
  0x9f   : > { %883 = vmatpush1.bf16.msra.mxu0 %v882_v38  ;;  %v498_v38 = vrot.slane %v397_v60, %v497_v22 }
  0xa0   : > { %885 = vmatprep.subr.bf16.mxu0 %v884_v39  ;;  %v502_v39 = vrot.slane %v398_v61, %v497_v22  ;;  %v572_v22 = vld [vmem:[#allocation7] sm:$0xff] }
  0xa3   : > { %887 = vmatpush1.bf16.msra.mxu0 %v886_v44 }
  0xa4   : > { %889 = vmatprep.subr.bf16.mxu0 %v888_v45 }
  0xa7   : > { %891 = vmatpush1.bf16.msra.mxu0 %v890_v48 }
  0xaa   : > { %391 = vmatmul.mubr.f32.vlgmr.msra.gmra.mrb[0].mxu0 %v293_v49 }
 0x17d   : > { %v1477_v50 = vpop.f32.mrb[0].mxu0 }
 0x17e   : > { %454 = vrot.lane.b32.xlu1 %v1477_v50, %s1222_s24  ;;  %420 = vrot.lane.b32.xlu0 %v1477_v50, %s1223_s26  ;;  %v1481_v51 = vpop.f32.mrb[1].mxu0 }
 0x182   : > { %401 = vrot.lane.b32.xlu0 %v1477_v50, %s1224_s11  ;;  %456 = vrot.lane.b32.xlu1 %v1481_v51, %s1222_s24  ;;  %s669_s24 = scalar_lea.sflag [#allocation4], %s1458_s6 }
 0x186   : > { %437 = vrot.lane.b32.xlu0 %v1477_v50, %s1225_s13  ;;  %403 = vrot.lane.b32.xlu1 %v1481_v51, %s1224_s11  ;;  %s1230_s11 = smov [#allocation10]  }
 0x18a   : > { %471 = vrot.lane.b32.xlu0 %v1477_v50, %s1226_s15  ;;  %439 = vrot.lane.b32.xlu1 %v1481_v51, %s1225_s13  ;;  %s1111_s13 = sshll.u32 %s1230_s11, 4  ;;  %s1112_s13 = int_to_ptr.vmem [resolvable:$false] %s1111_s13 }
 0x18b   : > { %p1114_p12 = scmp.lt.s32.totalorder %s1548_s27, %s1112_s13 }
 0x18e   : > { %473 = vrot.lane.b32.xlu1 %v1481_v51, %s1226_s15  ;;  %422 = vrot.lane.b32.xlu0 %v1481_v51, %s1223_s26  ;;  %s1107_s26 = scalar_lea.vmem %s1548_s27, 256  ;;  %s1113_s15 = scalar_lea.vmem %s1112_s13, 512 }
 0x18f   : > { %p1108_p10 = scmp.ne.s32.totalorder %s1548_s27, %s1107_s26  ;;  %p1115_p1 = scmp.lt.s32.totalorder %s1113_s15, %s1107_s26 }
 0x191   : > { %p1109_p3 = pnand %p1108_p10, %p1413_p5  ;;  %p1116_p2 = por %p1115_p1, %p1114_p12 }
 0x192   : > { %507 = vrot.lane.b32.xlu1 %v1481_v51, %s1227_s16  ;;  %505 = vrot.lane.b32.xlu0 %v1477_v50, %s1227_s16 }
 0x193   : > { %p1110_p7 = pneg %p1109_p3 }
 0x195   : > { %p1117_p4 = pnand %p1116_p2, %p1110_p7 }
 0x196   : > { %490 = vrot.lane.b32.xlu1 %v1481_v51, %s1228_s10  ;;  %488 = vrot.lane.b32.xlu0 %v1477_v50, %s1228_s10 }
 0x19a   : > { %524 = vrot.lane.b32.xlu1 %v1481_v51, %s1229_s8  ;;  %522 = vrot.lane.b32.xlu0 %v1477_v50, %s1229_s8 }
 0x1f0   : > { %v455_v53 = vpop.permute.xlu1 %454  ;;  %v421_v54 = vpop.permute.xlu0 %420 }
 0x1f4   : > { %v402_v56 = vpop.permute.xlu0 %401  ;;  %v457_v58 = vpop.permute.xlu1 %456 }
 0x1f5   : > { %v459_v11 = vsel %vm458_vm0, %v455_v53, %v457_v58  ;;  %v460_v12 = vsel %vm458_vm0, %v457_v58, %v455_v53 }
 0x1f6   : > { %v469_v23 = vmul.f32 %v464_v3, %v460_v12  ;;  %v470_v24 = vmul.f32 %v468_v4, %v459_v11 }
 0x1f8   : > { %v438_v0 = vpop.permute.xlu0 %437  ;;  %v404_v1 = vpop.permute.xlu1 %403  ;;  %v547_v40 = vrot.slane %v469_v23, 4  ;;  %v548_v41 = vrot.slane %v470_v24, 4 }
 0x1f9   : > { %v408_v26 = vsel %vm407_vm1, %v402_v56, %v404_v1  ;;  %v409_v27 = vsel %vm407_vm1, %v404_v1, %v402_v56 }
 0x1fa   : > { %v418_v42 = vmul.f32 %v413_v6, %v409_v27  ;;  %v419_v43 = vmul.f32 %v417_v7, %v408_v26 }
 0x1fc   : > { %v472_v13 = vpop.permute.xlu0 %471  ;;  %v440_v14 = vpop.permute.xlu1 %439 }
 0x1fd   : > { %v442_v17 = vsel %vm441_vm2, %v438_v0, %v440_v14  ;;  %v443_v18 = vsel %vm441_vm2, %v440_v14, %v438_v0 }
 0x1fe   : > { %v452_v28 = vmul.f32 %v447_v9, %v443_v18  ;;  %v453_v29 = vmul.f32 %v451_v10, %v442_v17  ;;  %v848_v9 = vld [vmem:[#allocation8 + $0x18] ss:$0 sm:$0xff] }
 0x200   : > { %v474_v30 = vpop.permute.xlu1 %473  ;;  %v423_v31 = vpop.permute.xlu0 %422  ;;  %v566_v55 = vsel %vm563_vm4, %v452_v28, %v547_v40 }
 0x201   : > { %v476_v32 = vsel %vm475_vm3, %v472_v13, %v474_v30  ;;  %v477_v33 = vsel %vm475_vm3, %v474_v30, %v472_v13  ;;  %v425_v34 = vsel %vm424_vm5, %v421_v54, %v423_v31  ;;  %v426_v35 = vsel %vm424_vm5, %v423_v31, %v421_v54 }
 0x202   : > { %v435_v36 = vmul.f32 %v430_v19, %v426_v35  ;;  %v436_v37 = vmul.f32 %v434_v20, %v425_v34  ;;  %v486_v44 = vmul.f32 %v481_v15, %v476_v32  ;;  %v487_v45 = vmul.f32 %v485_v16, %v477_v33  ;;  %v847_v20 = vld [vmem:[#allocation8 + $0x10] ss:$0 sm:$0xff] }
 0x203   : > { %v567_v54 = vsel %vm563_vm4, %v453_v29, %v548_v41 }
 0x204   : > { %v541_v46 = vrot.slane %v435_v36, 4  ;;  %v542_v47 = vrot.slane %v436_v37, 4  ;;  %v508_v48 = vpop.permute.xlu1 %507  ;;  %v506_v49 = vpop.permute.xlu0 %505  ;;  %v553_v63 = vrot.slane %v486_v44, 4  ;;  %v554_v0 = vrot.slane %v487_v45, 4 }
 0x205   : > { %v510_v52 = vsel %vm509_vm6, %v506_v49, %v508_v48  ;;  %v511_v53 = vsel %vm509_vm6, %v508_v48, %v506_v49 }
 0x206   : > { %v520_v56 = vmul.f32 %v515_v21, %v510_v52  ;;  %v521_v58 = vmul.f32 %v519_v25, %v511_v53  ;;  %v565_v59 = vsel %vm563_vm4, %v419_v43, %v542_v47  ;;  %v564_v60 = vsel %vm563_vm4, %v418_v42, %v541_v46 }
 0x207   : > { %v892_v61 = vpack.c.bf16 %v567_v54, %v565_v59  ;;  %v894_v62 = vpack.c.bf16 %v566_v55, %v564_v60  ;;  %v569_v12 = vsel %vm563_vm4, %v1481_v51, %v554_v0  ;;  %v568_v14 = vsel %vm563_vm4, %v1477_v50, %v553_v63 }
 0x208   : > { %v491_v1 = vpop.permute.xlu1 %490  ;;  %v489_v2 = vpop.permute.xlu0 %488  ;;  %v559_v5 = vrot.slane %v520_v56, 4  ;;  %v560_v6 = vrot.slane %v521_v58, 4 }
 0x209   : > { %v493_v3 = vsel %vm492_vm7, %v489_v2, %v491_v1  ;;  %v494_v4 = vsel %vm492_vm7, %v491_v1, %v489_v2  ;;  %893 = vmatprep.subr.bf16.mxu1 %v892_v61 }
 0x20a   : > { %v503_v7 = vmul.f32 %v498_v38, %v493_v3  ;;  %v504_v8 = vmul.f32 %v502_v39, %v494_v4  ;;  %895 = vmatpush1.bf16.msra.mxu1 %v894_v62 }
 0x20c   : > { %v525_v10 = vpop.permute.xlu1 %524  ;;  %v523_v11 = vpop.permute.xlu0 %522  ;;  %v571_v13 = vsel %vm563_vm4, %v504_v8, %v560_v6  ;;  %v570_v15 = vsel %vm563_vm4, %v503_v7, %v559_v5 }
 0x20d   : > { %v528_v16 = vsel %vm526_vm8, %v525_v10, %v523_v11  ;;  %v896_v17 = vpack.c.bf16 %v571_v13, %v569_v12  ;;  %v898_v18 = vpack.c.bf16 %v570_v15, %v568_v14  ;;  %v527_v21 = vsel %vm526_vm8, %v523_v11, %v525_v10 }
 0x20e   : > { %v538_v19 = vmul.f32 %v848_v9, %v528_v16  ;;  %v537_v51 = vmul.f32 %v847_v20, %v527_v21 }
 0x20f   : > { %897 = vmatprep.subr.bf16.mxu1 %v896_v17 }
 0x210   : > { %899 = vmatpush1.bf16.msra.mxu1 %v898_v18 }
 0x211   : > { %849 = vmatprep.subr.msk.mxu1 %vm563_vm4, %v538_v19 }
 0x214   : > { %850 = vmatpush1.msk.msra.mxu1 %vm563_vm4, %v537_v51 }
 0x215   : > { %851 = vmatmul.mubr.msk.f32.vlgmr.msra.gmra.mrb[0].mxu1 %vm573_vm9, %v572_v22 }
 0x2e8   : > { %v649_v50 = vpop.f32.mrb[0].mxu1 }
 0x2e9   : > { %654 = vst [vmem:[%s285_s23] sm:$0xff] %v649_v50  ;;  %v651_v23 = vpop.f32.mrb[1].mxu1  ;;  %v659_v57 = vmul.f32 %v649_v50, %v649_v50 }
 0x2ea   : > { %655 = vst [vmem:[%s285_s23 + $0x8] sm:$0xff] %v651_v23  ;;  %v660_v24 = vmul.f32 %v651_v23, %v651_v23  ;;  %v656_v25 = vadd.f32 %v651_v23, %v649_v50 }
 0x2ec   : > { %657 = vadd.xlane.f32.xlu0 %v656_v25  ;;  %v661_v26 = vadd.f32 %v660_v24, %v659_v57 }
 0x2ee   : > { %662 = vadd.xlane.f32.xlu1 %v661_v26 }
 0x2ef   : > { %1120 = shalt.err (!%p1117_p4)
}
 0x2f0   : > { %s1121_s16 = scalar_lea.hbm %s686_s17, 256  ;;  %s1125_s9 = scalar_lea.hbm %s1624_s4, 512 }
 0x2f1   : > { %p1122_p0 = scmp.ne.s32.totalorder %s686_s17, %s1121_s16  ;;  %p1126_p8 = scmp.lt.u32.totalorder %s686_s17, %s1624_s4 }
 0x2f2   : > { %p1127_p13 = scmp.lt.u32.totalorder %s1125_s9, %s1121_s16  ;;  %p1129_p10 = scmp.lt.u32.totalorder %s1121_s16, %s686_s17 }
 0x2f3   : > { %p1123_p9 = pnand %p1122_p0, %p1413_p5 }
 0x2f4   : > { %p1128_p6 = por %p1127_p13, %p1126_p8 }
 0x2f5   : > { %p1124_p11 = pneg %p1123_p9 }
 0x2f6   : > { %p1130_p3 = por %p1129_p10, %p1128_p6 }
 0x2f8   : > { %p1131_p7 = pnand %p1130_p3, %p1124_p11 }
 0x2fa   : > { %1134 = shalt.err (!%p1131_p7)
}
 0x2fb   : > { %914 = dma.vmem_to_hbm [thread:$0]  (%p1413_p5), %s1548_s27, 256, %s686_s17, %s669_s24   ;;  %vm664_vm10 = vcmask 7168   ;;  %vm666_vm11 = vcmask 15360  }
 0x2fc   : > { %s846_s28 = sshll.u32 %s1458_s6, 3  ;;  %s856_s29 = sshll.u32 %s1283_s22, 7 }
 0x2fd   : > { %s292_s26 = scalar_lea.vmem [#allocation11], %s846_s28  ;;  %s1576_s16 = scalar_lea.hbm %s1625_s5, %s856_s29 }
 0x2fe   : > { %s701_s11 = sshll.u32 %s292_s26, 4  ;;  %s674_s27 = scalar_lea.sflag [#allocation12], %s1458_s6  ;;  %s1578_s11 = int_to_ptr.vmem [resolvable:$true] %s701_s11 }
 0x2ff   : > { %s1135_s22 = scalar_lea.vmem %s1578_s11, 128  ;;  %s1231_s17 = smov [#allocation11]  }
 0x300   : > { %p1136_p12 = scmp.ne.s32.totalorder %s1578_s11, %s1135_s22  ;;  %s1139_s24 = sshll.u32 %s1231_s17, 4  ;;  %s1140_s24 = int_to_ptr.vmem [resolvable:$false] %s1139_s24 }
 0x301   : > { %s1141_s10 = scalar_lea.vmem %s1140_s24, 256  ;;  %p1142_p4 = scmp.lt.s32.totalorder %s1578_s11, %s1140_s24 }
 0x302   : > { %p1137_p1 = pnand %p1136_p12, %p1413_p5  ;;  %p1143_p0 = scmp.lt.s32.totalorder %s1141_s10, %s1135_s22 }
 0x304   : > { %p1138_p2 = pneg %p1137_p1  ;;  %p1144_p9 = por %p1143_p0, %p1142_p4 }
 0x306   : > { %p1145_p11 = pnand %p1144_p9, %p1138_p2 }
 0x379   : > { %v658_v27 = vpop.xlane.xlu0 %657 }
 0x37b   : > { %v663_v28 = vpop.xlane.xlu1 %662 }
 0x37c   : > { %v665_v29 = vsel %vm664_vm10, %v658_v27, %v663_v28 }
 0x37d   : > { %667 = vst.msk [vmem:[%s292_s26] sm:$0xff] %vm666_vm11, %v665_v29 }
 0x37e   : > { %1148 = shalt.err (!%p1145_p11)
}
 0x37f   : > { %s1149_s6 = scalar_lea.hbm %s1576_s16, 128  ;;  %s1153_s23 = scalar_lea.hbm %s1625_s5, 256 }
 0x380   : > { %p1150_p8 = scmp.ne.s32.totalorder %s1576_s16, %s1149_s6  ;;  %p1154_p10 = scmp.lt.u32.totalorder %s1576_s16, %s1625_s5 }
 0x381   : > { %p1155_p3 = scmp.lt.u32.totalorder %s1153_s23, %s1149_s6  ;;  %p1157_p12 = scmp.lt.u32.totalorder %s1149_s6, %s1576_s16 }
 0x382   : > { %p1151_p13 = pnand %p1150_p8, %p1413_p5 }
 0x383   : > { %p1156_p7 = por %p1155_p3, %p1154_p10 }
 0x384   : > { %p1152_p6 = pneg %p1151_p13 }
 0x385   : > { %p1158_p1 = por %p1157_p12, %p1156_p7 }
 0x387   : > { %p1159_p2 = pnand %p1158_p1, %p1152_p6 }
 0x389   : > { %1162 = shalt.err (!%p1159_p2)
}
 0x38a   : > { %915 = dma.vmem_to_hbm [thread:$0]  (%p1413_p5), %s1578_s11, 128, %s1576_s16, %s674_s27  }
 0x38b PF: > { %s713_s29 = sand.u32 1, %s1201_s18   ;;  %p1643_p4 = scmp.ne.s32.totalorder %s1630_s25, 0 }
 0x38c   : > { %p1644_p0 = scmp.ge.s32.totalorder %s1213_s21, 2  ;;  %s714_s26 = scalar_lea.sflag [#allocation4], %s713_s29 }
 0x38e   : > { %p933_p9 = pnand %p1644_p0, %p1643_p4 }
 0x390   : > { %1192 = dma.done.wait (!%p933_p9), %s714_s26, 256  }
 0x391   : > { %1194 = vsyncadd (!%p933_p9), %s714_s26, 4294967040  ;;  %s723_s13 = scalar_lea.sflag [#allocation12], %s713_s29 }
 0x392   : > { %1196 = dma.done.wait (!%p933_p9), %s723_s13, 128  }
 0x393   : > { %1198 = vsyncadd (!%p933_p9), %s723_s13, 4294967168  ;;  %p24_p5 = scmp.ge.s32.totalorder %s1399_s14, 4   ;;  %s1645_s18 = smov %s1205_s19 }
 0x394   : > { %s1646_s19 = smov %s1209_s20  ;;  %s1647_s20 = smov %s1409_s30 }
 0x395   : > { %s1648_s21 = smov %s1399_s14  ;;  %26 = sbr.rel (!%p24_p5) target bundleno = 9 (0x9), region = 110 }
 0x39c   :  { %728 = vsyncpa [#allocation3], 1 }
 0x39d   :  { %730 = vsyncpa [#allocation3 + $0x1], 1 }
 0x39e   :  { %731 = vsyncpa [#allocation6], 1 }
 0x39f   :  { %732 = vsyncpa [#allocation9], 1 }
 0x3a0   :  { %733 = vsyncpa [#allocation4], 1 }
 0x3a1   :  { %735 = vsyncpa [#allocation4 + $0x1], 1 }
 0x3a2   :  { %736 = vsyncpa [#allocation12], 1 }
 0x3a3   :  { %738 = vsyncpa [#allocation12 + $0x1], 1 }

</bundles_post_ra>
